<compile_context>
chip_gen: v7x
topology: tpu7x:2x2x1
jax: 0.10.0
libtpu: 0.0.40
codegen_flags: <defaults>
</compile_context>

<pallas_src>
from functools import partial

import jax
import jax.numpy as jnp
from jax.experimental import pallas as pl
from jax.experimental.pallas import tpu as pltpu

BN_EPS = 1e-5


def _res2_kernel(x_ref, w_ref, g_ref, b_ref, o_ref,
                 z_ref, sum_ref, sq_ref, a_ref, shift_ref,
                 *, nums, nb, tb, inv_count):
    """Blocks per grid step:
      x_ref            : (Nb, width, Tt)    input split block of the current phase
      w_ref            : (1, width, width)  conv weight of the current split
      g_ref, b_ref     : (1, width, 1)      BN gamma/beta of the current split
      o_ref            : (Nb, width, Tt)    output chunk written this step (phases >= 1)
      z_ref            : (N*Tb, width, Tt)  VMEM cache of pre-BN conv+ReLU for current split
      sum_ref, sq_ref  : (width, 1)         one-pass BN statistic accumulators
      a_ref, shift_ref : (width, 1)         fused BN scale / shift of the previous split
    """
    p = pl.program_id(0)          # phase: 0 .. nums
    n = pl.program_id(1)          # batch block
    t = pl.program_id(2)          # time tile

    first_stat = jnp.logical_and(n == 0, t == 0)
    last_stat = jnp.logical_and(n == pl.num_programs(1) - 1,
                                t == pl.num_programs(2) - 1)

    def z_row(j):
        # Row in the flattened z cache for batch element j of this block at this time tile.
        return (n * nb + j) * tb + t

    def conv_relu_stats(j, sp):
        # 1x1 TDNN conv (context=[0], no bias) -> MXU matmul, then ReLU, then stat accumulate.
        z = jnp.maximum(
            jnp.dot(w_ref[0], sp, preferred_element_type=jnp.float32), 0.0)
        z_ref[z_row(j)] = z
        sum_ref[...] += jnp.sum(z, axis=1, keepdims=True)
        sq_ref[...] += jnp.sum(z * z, axis=1, keepdims=True)

    # Zero the batch-statistic accumulators at the first (n, t) step of a conv phase.
    @pl.when(jnp.logical_and(p < nums, first_stat))
    def _():
        sum_ref[...] = jnp.zeros_like(sum_ref)
        sq_ref[...] = jnp.zeros_like(sq_ref)

    @pl.when(p == 0)
    def _():
        # Split 0: sp = spx[0].  (Pass-through split is handled via input/output aliasing.)
        for j in range(nb):
            conv_relu_stats(j, x_ref[j])

    @pl.when(jnp.logical_and(p > 0, p < nums))
    def _():
        for j in range(nb):
            # Normalize split p-1 (fused mul-add on the cached z) and write its output chunk.
            y = a_ref[...] * z_ref[z_row(j)] + shift_ref[...]
            o_ref[j] = y.astype(o_ref.dtype)
            # Split p: sp = y_{p-1} + spx[p]
            conv_relu_stats(j, x_ref[j] + y)

    @pl.when(p == nums)
    def _():
        # Final phase: normalize and write the last computed split (nums - 1).
        for j in range(nb):
            y = a_ref[...] * z_ref[z_row(j)] + shift_ref[...]
            o_ref[j] = y.astype(o_ref.dtype)

    # Fold BN into per-channel (a, shift) once all of this split's stats are in.
    @pl.when(jnp.logical_and(p < nums, last_stat))
    def _():
        mean = sum_ref[...] * inv_count
        var = sq_ref[...] * inv_count - mean * mean
        a = g_ref[0] * jax.lax.rsqrt(var + BN_EPS)
        a_ref[...] = a
        shift_ref[...] = b_ref[0] - mean * a


def _choose_t_tile(T, max_tile=2048):
    """Largest multiple of 128 that divides T (<= max_tile); full T if T % 128 != 0."""
    if T % 128 != 0:
        return T          # full-extent block: correct, but masked partial stores
    best, cand = 128, 128
    while cand <= min(T, max_tile):
        if T % cand == 0:
            best = cand
        cand += 128
    return best


def _choose_batch_block(N, width, tt, itemsize, max_nb=8, max_bytes=4 << 20):
    """Largest divisor of N (<= max_nb) keeping the per-step block <= ~4 MiB."""
    best = 1
    for cand in range(1, min(N, max_nb) + 1):
        if N % cand == 0 and cand * width * tt * itemsize <= max_bytes:
            best = cand
    return best


@partial(jax.jit, static_argnames=("scale",), donate_argnums=(0,))
def res2conv1d_relu_bn(x, conv_w, bn_gamma, bn_beta, *, scale):
    """x: (N, C, T). conv_w: (nums, width, width). bn_gamma/beta: (nums, width, 1).

    NOTE: x is donated (the output aliases it to keep the pass-through split copy-free);
    do not reuse x after calling this function.
    """
    N, C, T = x.shape
    assert scale > 1 and C % scale == 0
    width = C // scale
    nums = scale - 1
    assert width % 8 == 0, "width (= channels // scale) must be a multiple of 8 for f32 tiling"

    itemsize = x.dtype.itemsize
    tt = _choose_t_tile(T)
    tb = T // tt
    nb = _choose_batch_block(N, width, tt, itemsize)
    n_blocks = N // nb

    kernel = partial(_res2_kernel, nums=nums, nb=nb, tb=tb,
                     inv_count=1.0 / float(N * T))
    grid = (nums + 1, n_blocks, tb)

    # --- Block-index maps (block units: batch block nb, channel block width, time block tt).
    def x_map(p, n, t):
        # Final phase needs no input: pin to the previously fetched block -> no extra DMA.
        live = p < nums
        return (jnp.where(live, n, n_blocks - 1),
                jnp.where(live, p, nums - 1),
                jnp.where(live, t, tb - 1))

    def wgb_map(p, n, t):
        # One small fetch per phase; pinned (no refetch) during the final phase.
        return (jnp.minimum(p, nums - 1), 0, 0)

    def o_map(p, n, t):
        # Phase 0 never writes: map it to phase 1's first write target so the block index
        # stays constant until the first legitimate write (no uninitialized writeback).
        live = p > 0
        return (jnp.where(live, n, 0),
                jnp.where(live, p - 1, 0),
                jnp.where(live, t, 0))

    # --- VMEM budget: z cache + double-buffered in/out blocks + params, with headroom.
    blk_bytes = nb * width * tt * itemsize
    z_bytes = N * width * T * 4
    param_bytes = 2 * (width * width + 2 * width) * 4 + (256 << 10)
    need = z_bytes + 2 * blk_bytes + 2 * blk_bytes + param_bytes
    vmem_limit = int(need * 1.3) + (4 << 20)
    try:
        phys_vmem = int(pltpu.get_tpu_info().vmem_capacity_bytes)
    except Exception:
        phys_vmem = 64 << 20
    vmem_limit = min(max(vmem_limit, 32 << 20), int(phys_vmem * 0.9))

    out = pl.pallas_call(
        kernel,
        out_shape=jax.ShapeDtypeStruct((N, C, T), x.dtype),
        grid=grid,
        in_specs=[
            pl.BlockSpec((nb, width, tt), x_map),
            pl.BlockSpec((1, width, width), wgb_map),
            pl.BlockSpec((1, width, 1), wgb_map),
            pl.BlockSpec((1, width, 1), wgb_map),
        ],
        out_specs=pl.BlockSpec((nb, width, tt), o_map),
        scratch_shapes=[
            pltpu.VMEM((N * tb, width, tt), jnp.float32),  # z cache for the current split
            pltpu.VMEM((width, 1), jnp.float32),           # sum
            pltpu.VMEM((width, 1), jnp.float32),           # sum of squares
            pltpu.VMEM((width, 1), jnp.float32),           # fused BN scale  (prev split)
            pltpu.VMEM((width, 1), jnp.float32),           # fused BN shift  (prev split)
        ],
        input_output_aliases={0: 0},   # output aliases x -> pass-through split is free
        compiler_params=pltpu.CompilerParams(
            dimension_semantics=("arbitrary", "arbitrary", "arbitrary"),
            vmem_limit_bytes=vmem_limit),
    )(x, conv_w, bn_gamma, bn_beta)
    return out


def _reference(x, conv_w, bn_gamma, bn_beta, *, scale):
    """Pure-JAX reference mirroring the PyTorch forward (training-mode BN)."""
    N, C, T = x.shape
    width = C // scale
    nums = scale - 1
    spx = [x[:, i * width:(i + 1) * width, :] for i in range(scale)]
    out = []
    sp = None
    for i in range(nums):
        sp = spx[i] if i == 0 else sp + spx[i]
        y = jnp.einsum("oc,nct->not", conv_w[i], sp)
        y = jnp.maximum(y, 0.0)
        mean = jnp.mean(y, axis=(0, 2), keepdims=True)
        var = jnp.mean((y - mean) ** 2, axis=(0, 2), keepdims=True)
        y = (y - mean) / jnp.sqrt(var + BN_EPS)
        y = y * bn_gamma[i][None] + bn_beta[i][None]
        out.append(y)
        sp = y
    out.append(spx[nums])
    return jnp.concatenate(out, axis=1)


if __name__ == "__main__":
    # Small shapes consistent with the module: batch=2, channels=32, time=128, scale=4.
    # T is a multiple of 128 so output stores stay lane-dense.
    N, C, T, scale = 2, 32, 128, 4
    width = C // scale
    nums = scale - 1

    key = jax.random.PRNGKey(0)
    kx, kw, kg, kb = jax.random.split(key, 4)

    x = jax.random.normal(kx, (N, C, T), dtype=jnp.float32)
    # TdnnAffine weight (out, in, context=1) -> (nums, width, width)
    conv_w = 0.3 * jax.random.normal(kw, (nums, width, width), dtype=jnp.float32)
    # BatchNorm1d affine params, shaped (nums, width, 1) for lane-broadcast in the kernel
    bn_gamma = 1.0 + 0.1 * jax.random.normal(kg, (nums, width, 1), dtype=jnp.float32)
    bn_beta = 0.1 * jax.random.normal(kb, (nums, width, 1), dtype=jnp.float32)

    # Compute the reference BEFORE the kernel call: x is donated (aliased to the output).
    ref = jax.block_until_ready(_reference(x, conv_w, bn_gamma, bn_beta, scale=scale))

    out = res2conv1d_relu_bn(x, conv_w, bn_gamma, bn_beta, scale=scale)
    out = jax.block_until_ready(out)

    assert out.shape == (N, C, T)
    assert jnp.allclose(out, ref, atol=2e-3, rtol=2e-3), "mismatch vs reference"

    print("KERNEL_OK")
</pallas_src>

<mosaic_0001>
module attributes {stable_mosaic.version = 11 : i64} {
  func.func @_res2_kernel(%arg0: i32, %arg1: i32, %arg2: i32, %arg3: memref<2x8x128xf32, #tpu.memory_space<vmem>>, %arg4: memref<1x8x8xf32, #tpu.memory_space<vmem>>, %arg5: memref<1x8x1xf32, #tpu.memory_space<vmem>>, %arg6: memref<1x8x1xf32, #tpu.memory_space<vmem>>, %arg7: memref<2x8x128xf32, #tpu.memory_space<vmem>>, %arg8: memref<2x8x128xf32, #tpu.memory_space<vmem>>, %arg9: memref<8x1xf32, #tpu.memory_space<vmem>>, %arg10: memref<8x1xf32, #tpu.memory_space<vmem>>, %arg11: memref<8x1xf32, #tpu.memory_space<vmem>>, %arg12: memref<8x1xf32, #tpu.memory_space<vmem>>) attributes {dimension_semantics = [#tpu.dimension_semantics<arbitrary>, #tpu.dimension_semantics<arbitrary>, #tpu.dimension_semantics<arbitrary>], iteration_bounds = array<i64: 4, 1, 1>, scalar_prefetch = 0 : i64, scratch_operands = 5 : i64, tpu.core_type = #tpu.core_type<tc>, window_params = [{transform_indices = @transform_0, window_bounds = array<i64: 2, 8, 128>}, {transform_indices = @transform_1, window_bounds = array<i64: 1, 8, 8>}, {transform_indices = @transform_2, window_bounds = array<i64: 1, 8, 1>}, {transform_indices = @transform_3, window_bounds = array<i64: 1, 8, 1>}, {transform_indices = @transform_4, window_bounds = array<i64: 2, 8, 128>}]} {
    %c0_i32 = arith.constant 0 : i32
    %0 = arith.cmpi eq, %arg1, %c0_i32 : i32
    %c0_i32_0 = arith.constant 0 : i32
    %1 = arith.cmpi eq, %arg2, %c0_i32_0 : i32
    %2 = arith.andi %0, %1 : i1
    %c0_i32_1 = arith.constant 0 : i32
    %3 = arith.cmpi eq, %arg1, %c0_i32_1 : i32
    %c0_i32_2 = arith.constant 0 : i32
    %4 = arith.cmpi eq, %arg2, %c0_i32_2 : i32
    %5 = arith.andi %3, %4 : i1
    %c3_i32 = arith.constant 3 : i32
    %6 = arith.cmpi slt, %arg0, %c3_i32 : i32
    %7 = arith.andi %6, %2 : i1
    %8 = arith.extui %7 : i1 to i32
    %c0_i32_3 = arith.constant 0 : i32
    %9 = arith.cmpi ne, %8, %c0_i32_3 : i32
    scf.if %9 {
      %cst = arith.constant 0.000000e+00 : f32
      %25 = vector.broadcast %cst : f32 to vector<8x1xf32>
      %c0 = arith.constant 0 : index
      %c0_13 = arith.constant 0 : index
      %26 = vector.load %arg9[%c0, %c0_13] : memref<8x1xf32, #tpu.memory_space<vmem>>, vector<8x1xf32>
      tpu.vector_store %arg9[%c0, %c0_13], %25 {strides = array<i32>} : memref<8x1xf32, #tpu.memory_space<vmem>>, vector<8x1xf32>,
      %cst_14 = arith.constant 0.000000e+00 : f32
      %27 = vector.broadcast %cst_14 : f32 to vector<8x1xf32>
      %c0_15 = arith.constant 0 : index
      %c0_16 = arith.constant 0 : index
      %28 = vector.load %arg10[%c0_15, %c0_16] : memref<8x1xf32, #tpu.memory_space<vmem>>, vector<8x1xf32>
      tpu.vector_store %arg10[%c0_15, %c0_16], %27 {strides = array<i32>} : memref<8x1xf32, #tpu.memory_space<vmem>>, vector<8x1xf32>,
    } else {
    }
    %c0_i32_4 = arith.constant 0 : i32
    %10 = arith.cmpi eq, %arg0, %c0_i32_4 : i32
    %11 = arith.extui %10 : i1 to i32
    %c0_i32_5 = arith.constant 0 : i32
    %12 = arith.cmpi ne, %11, %c0_i32_5 : i32
    scf.if %12 {
      %c0 = arith.constant 0 : index
      %c0_13 = arith.constant 0 : index
      %c0_14 = arith.constant 0 : index
      %25 = vector.load %arg3[%c0, %c0_13, %c0_14] : memref<2x8x128xf32, #tpu.memory_space<vmem>>, vector<1x8x128xf32>
      %26 = vector.shape_cast %25 : vector<1x8x128xf32> to vector<8x128xf32>
      %c0_15 = arith.constant 0 : index
      %c0_16 = arith.constant 0 : index
      %c0_17 = arith.constant 0 : index
      %27 = vector.load %arg4[%c0_15, %c0_16, %c0_17] : memref<1x8x8xf32, #tpu.memory_space<vmem>>, vector<1x8x8xf32>
      %28 = vector.shape_cast %27 : vector<1x8x8xf32> to vector<8x8xf32>
      %cst = arith.constant dense<0.000000e+00> : vector<8x128xf32>
      %29 = tpu.matmul %28, %26, %cst {dimension_numbers = #tpu.dot_dimension_numbers<[1], [0], [0], [1], [0, 0, 1, 1], [], []>} : vector<8x8xf32>, vector<8x128xf32>, vector<8x128xf32> -> vector<8x128xf32>
      %cst_18 = arith.constant 0.000000e+00 : f32
      %30 = vector.broadcast %cst_18 : f32 to vector<8x128xf32>
      %31 = arith.maximumf %29, %30 : vector<8x128xf32>
      %c2_i32 = arith.constant 2 : i32
      %32 = arith.muli %arg1, %c2_i32 : i32
      %c0_i32_19 = arith.constant 0 : i32
      %33 = arith.addi %32, %c0_i32_19 : i32
      %c1_i32 = arith.constant 1 : i32
      %34 = arith.muli %33, %c1_i32 : i32
      %35 = arith.addi %34, %arg2 : i32
      %36 = arith.index_cast %35 : i32 to index
      %c0_20 = arith.constant 0 : index
      %c0_21 = arith.constant 0 : index
      %37 = vector.load %arg8[%36, %c0_20, %c0_21] : memref<2x8x128xf32, #tpu.memory_space<vmem>>, vector<1x8x128xf32>
      %38 = vector.shape_cast %37 : vector<1x8x128xf32> to vector<8x128xf32>
      %39 = vector.shape_cast %31 : vector<8x128xf32> to vector<1x8x128xf32>
      tpu.vector_store %arg8[%36, %c0_20, %c0_21], %39 {strides = array<i32>} : memref<2x8x128xf32, #tpu.memory_space<vmem>>, vector<1x8x128xf32>,
      %c0_22 = arith.constant 0 : index
      %c0_23 = arith.constant 0 : index
      %40 = vector.load %arg9[%c0_22, %c0_23] : memref<8x1xf32, #tpu.memory_space<vmem>>, vector<8x1xf32>
      %cst_24 = arith.constant dense<0.000000e+00> : vector<8xf32>
      %41 = vector.multi_reduction <add>, %31, %cst_24 [1] : vector<8x128xf32> to vector<8xf32>
      %42 = vector.shape_cast %41 : vector<8xf32> to vector<8x1xf32>
      %43 = arith.addf %40, %42 : vector<8x1xf32>
      %c0_25 = arith.constant 0 : index
      %c0_26 = arith.constant 0 : index
      %44 = vector.load %arg9[%c0_25, %c0_26] : memref<8x1xf32, #tpu.memory_space<vmem>>, vector<8x1xf32>
      tpu.vector_store %arg9[%c0_25, %c0_26], %43 {strides = array<i32>} : memref<8x1xf32, #tpu.memory_space<vmem>>, vector<8x1xf32>,
      %c0_27 = arith.constant 0 : index
      %c0_28 = arith.constant 0 : index
      %45 = vector.load %arg10[%c0_27, %c0_28] : memref<8x1xf32, #tpu.memory_space<vmem>>, vector<8x1xf32>
      %46 = arith.mulf %31, %31 : vector<8x128xf32>
      %cst_29 = arith.constant dense<0.000000e+00> : vector<8xf32>
      %47 = vector.multi_reduction <add>, %46, %cst_29 [1] : vector<8x128xf32> to vector<8xf32>
      %48 = vector.shape_cast %47 : vector<8xf32> to vector<8x1xf32>
      %49 = arith.addf %45, %48 : vector<8x1xf32>
      %c0_30 = arith.constant 0 : index
      %c0_31 = arith.constant 0 : index
      %50 = vector.load %arg10[%c0_30, %c0_31] : memref<8x1xf32, #tpu.memory_space<vmem>>, vector<8x1xf32>
      tpu.vector_store %arg10[%c0_30, %c0_31], %49 {strides = array<i32>} : memref<8x1xf32, #tpu.memory_space<vmem>>, vector<8x1xf32>,
      %c1 = arith.constant 1 : index
      %c0_32 = arith.constant 0 : index
      %c0_33 = arith.constant 0 : index
      %51 = vector.load %arg3[%c1, %c0_32, %c0_33] : memref<2x8x128xf32, #tpu.memory_space<vmem>>, vector<1x8x128xf32>
      %52 = vector.shape_cast %51 : vector<1x8x128xf32> to vector<8x128xf32>
      %c0_34 = arith.constant 0 : index
      %c0_35 = arith.constant 0 : index
      %c0_36 = arith.constant 0 : index
      %53 = vector.load %arg4[%c0_34, %c0_35, %c0_36] : memref<1x8x8xf32, #tpu.memory_space<vmem>>, vector<1x8x8xf32>
      %54 = vector.shape_cast %53 : vector<1x8x8xf32> to vector<8x8xf32>
      %cst_37 = arith.constant dense<0.000000e+00> : vector<8x128xf32>
      %55 = tpu.matmul %54, %52, %cst_37 {dimension_numbers = #tpu.dot_dimension_numbers<[1], [0], [0], [1], [0, 0, 1, 1], [], []>} : vector<8x8xf32>, vector<8x128xf32>, vector<8x128xf32> -> vector<8x128xf32>
      %cst_38 = arith.constant 0.000000e+00 : f32
      %56 = vector.broadcast %cst_38 : f32 to vector<8x128xf32>
      %57 = arith.maximumf %55, %56 : vector<8x128xf32>
      %c2_i32_39 = arith.constant 2 : i32
      %58 = arith.muli %arg1, %c2_i32_39 : i32
      %c1_i32_40 = arith.constant 1 : i32
      %59 = arith.addi %58, %c1_i32_40 : i32
      %c1_i32_41 = arith.constant 1 : i32
      %60 = arith.muli %59, %c1_i32_41 : i32
      %61 = arith.addi %60, %arg2 : i32
      %62 = arith.index_cast %61 : i32 to index
      %c0_42 = arith.constant 0 : index
      %c0_43 = arith.constant 0 : index
      %63 = vector.load %arg8[%62, %c0_42, %c0_43] : memref<2x8x128xf32, #tpu.memory_space<vmem>>, vector<1x8x128xf32>
      %64 = vector.shape_cast %63 : vector<1x8x128xf32> to vector<8x128xf32>
      %65 = vector.shape_cast %57 : vector<8x128xf32> to vector<1x8x128xf32>
      tpu.vector_store %arg8[%62, %c0_42, %c0_43], %65 {strides = array<i32>} : memref<2x8x128xf32, #tpu.memory_space<vmem>>, vector<1x8x128xf32>,
      %c0_44 = arith.constant 0 : index
      %c0_45 = arith.constant 0 : index
      %66 = vector.load %arg9[%c0_44, %c0_45] : memref<8x1xf32, #tpu.memory_space<vmem>>, vector<8x1xf32>
      %cst_46 = arith.constant dense<0.000000e+00> : vector<8xf32>
      %67 = vector.multi_reduction <add>, %57, %cst_46 [1] : vector<8x128xf32> to vector<8xf32>
      %68 = vector.shape_cast %67 : vector<8xf32> to vector<8x1xf32>
      %69 = arith.addf %66, %68 : vector<8x1xf32>
      %c0_47 = arith.constant 0 : index
      %c0_48 = arith.constant 0 : index
      %70 = vector.load %arg9[%c0_47, %c0_48] : memref<8x1xf32, #tpu.memory_space<vmem>>, vector<8x1xf32>
      tpu.vector_store %arg9[%c0_47, %c0_48], %69 {strides = array<i32>} : memref<8x1xf32, #tpu.memory_space<vmem>>, vector<8x1xf32>,
      %c0_49 = arith.constant 0 : index
      %c0_50 = arith.constant 0 : index
      %71 = vector.load %arg10[%c0_49, %c0_50] : memref<8x1xf32, #tpu.memory_space<vmem>>, vector<8x1xf32>
      %72 = arith.mulf %57, %57 : vector<8x128xf32>
      %cst_51 = arith.constant dense<0.000000e+00> : vector<8xf32>
      %73 = vector.multi_reduction <add>, %72, %cst_51 [1] : vector<8x128xf32> to vector<8xf32>
      %74 = vector.shape_cast %73 : vector<8xf32> to vector<8x1xf32>
      %75 = arith.addf %71, %74 : vector<8x1xf32>
      %c0_52 = arith.constant 0 : index
      %c0_53 = arith.constant 0 : index
      %76 = vector.load %arg10[%c0_52, %c0_53] : memref<8x1xf32, #tpu.memory_space<vmem>>, vector<8x1xf32>
      tpu.vector_store %arg10[%c0_52, %c0_53], %75 {strides = array<i32>} : memref<8x1xf32, #tpu.memory_space<vmem>>, vector<8x1xf32>,
    } else {
    }
    %c0_i32_6 = arith.constant 0 : i32
    %13 = arith.cmpi sgt, %arg0, %c0_i32_6 : i32
    %c3_i32_7 = arith.constant 3 : i32
    %14 = arith.cmpi slt, %arg0, %c3_i32_7 : i32
    %15 = arith.andi %13, %14 : i1
    %16 = arith.extui %15 : i1 to i32
    %c0_i32_8 = arith.constant 0 : i32
    %17 = arith.cmpi ne, %16, %c0_i32_8 : i32
    scf.if %17 {
      %c0 = arith.constant 0 : index
      %c0_13 = arith.constant 0 : index
      %25 = vector.load %arg11[%c0, %c0_13] : memref<8x1xf32, #tpu.memory_space<vmem>>, vector<8x1xf32>
      %c2_i32 = arith.constant 2 : i32
      %26 = arith.muli %arg1, %c2_i32 : i32
      %c0_i32_14 = arith.constant 0 : i32
      %27 = arith.addi %26, %c0_i32_14 : i32
      %c1_i32 = arith.constant 1 : i32
      %28 = arith.muli %27, %c1_i32 : i32
      %29 = arith.addi %28, %arg2 : i32
      %30 = arith.index_cast %29 : i32 to index
      %c0_15 = arith.constant 0 : index
      %c0_16 = arith.constant 0 : index
      %31 = vector.load %arg8[%30, %c0_15, %c0_16] : memref<2x8x128xf32, #tpu.memory_space<vmem>>, vector<1x8x128xf32>
      %32 = vector.shape_cast %31 : vector<1x8x128xf32> to vector<8x128xf32>
      %33 = vector.broadcast %25 : vector<8x1xf32> to vector<8x128xf32>
      %34 = arith.mulf %33, %32 : vector<8x128xf32>
      %c0_17 = arith.constant 0 : index
      %c0_18 = arith.constant 0 : index
      %35 = vector.load %arg12[%c0_17, %c0_18] : memref<8x1xf32, #tpu.memory_space<vmem>>, vector<8x1xf32>
      %36 = vector.broadcast %35 : vector<8x1xf32> to vector<8x128xf32>
      %37 = arith.addf %34, %36 : vector<8x128xf32>
      %c0_19 = arith.constant 0 : index
      %c0_20 = arith.constant 0 : index
      %c0_21 = arith.constant 0 : index
      %38 = vector.load %arg7[%c0_19, %c0_20, %c0_21] : memref<2x8x128xf32, #tpu.memory_space<vmem>>, vector<1x8x128xf32>
      %39 = vector.shape_cast %38 : vector<1x8x128xf32> to vector<8x128xf32>
      %40 = vector.shape_cast %37 : vector<8x128xf32> to vector<1x8x128xf32>
      tpu.vector_store %arg7[%c0_19, %c0_20, %c0_21], %40 {strides = array<i32>} : memref<2x8x128xf32, #tpu.memory_space<vmem>>, vector<1x8x128xf32>,
      %c0_22 = arith.constant 0 : index
      %c0_23 = arith.constant 0 : index
      %c0_24 = arith.constant 0 : index
      %41 = vector.load %arg3[%c0_22, %c0_23, %c0_24] : memref<2x8x128xf32, #tpu.memory_space<vmem>>, vector<1x8x128xf32>
      %42 = vector.shape_cast %41 : vector<1x8x128xf32> to vector<8x128xf32>
      %43 = arith.addf %42, %37 : vector<8x128xf32>
      %c0_25 = arith.constant 0 : index
      %c0_26 = arith.constant 0 : index
      %c0_27 = arith.constant 0 : index
      %44 = vector.load %arg4[%c0_25, %c0_26, %c0_27] : memref<1x8x8xf32, #tpu.memory_space<vmem>>, vector<1x8x8xf32>
      %45 = vector.shape_cast %44 : vector<1x8x8xf32> to vector<8x8xf32>
      %cst = arith.constant dense<0.000000e+00> : vector<8x128xf32>
      %46 = tpu.matmul %45, %43, %cst {dimension_numbers = #tpu.dot_dimension_numbers<[1], [0], [0], [1], [0, 0, 1, 1], [], []>} : vector<8x8xf32>, vector<8x128xf32>, vector<8x128xf32> -> vector<8x128xf32>
      %cst_28 = arith.constant 0.000000e+00 : f32
      %47 = vector.broadcast %cst_28 : f32 to vector<8x128xf32>
      %48 = arith.maximumf %46, %47 : vector<8x128xf32>
      %c2_i32_29 = arith.constant 2 : i32
      %49 = arith.muli %arg1, %c2_i32_29 : i32
      %c0_i32_30 = arith.constant 0 : i32
      %50 = arith.addi %49, %c0_i32_30 : i32
      %c1_i32_31 = arith.constant 1 : i32
      %51 = arith.muli %50, %c1_i32_31 : i32
      %52 = arith.addi %51, %arg2 : i32
      %53 = arith.index_cast %52 : i32 to index
      %c0_32 = arith.constant 0 : index
      %c0_33 = arith.constant 0 : index
      %54 = vector.load %arg8[%53, %c0_32, %c0_33] : memref<2x8x128xf32, #tpu.memory_space<vmem>>, vector<1x8x128xf32>
      %55 = vector.shape_cast %54 : vector<1x8x128xf32> to vector<8x128xf32>
      %56 = vector.shape_cast %48 : vector<8x128xf32> to vector<1x8x128xf32>
      tpu.vector_store %arg8[%53, %c0_32, %c0_33], %56 {strides = array<i32>} : memref<2x8x128xf32, #tpu.memory_space<vmem>>, vector<1x8x128xf32>,
      %c0_34 = arith.constant 0 : index
      %c0_35 = arith.constant 0 : index
      %57 = vector.load %arg9[%c0_34, %c0_35] : memref<8x1xf32, #tpu.memory_space<vmem>>, vector<8x1xf32>
      %cst_36 = arith.constant dense<0.000000e+00> : vector<8xf32>
      %58 = vector.multi_reduction <add>, %48, %cst_36 [1] : vector<8x128xf32> to vector<8xf32>
      %59 = vector.shape_cast %58 : vector<8xf32> to vector<8x1xf32>
      %60 = arith.addf %57, %59 : vector<8x1xf32>
      %c0_37 = arith.constant 0 : index
      %c0_38 = arith.constant 0 : index
      %61 = vector.load %arg9[%c0_37, %c0_38] : memref<8x1xf32, #tpu.memory_space<vmem>>, vector<8x1xf32>
      tpu.vector_store %arg9[%c0_37, %c0_38], %60 {strides = array<i32>} : memref<8x1xf32, #tpu.memory_space<vmem>>, vector<8x1xf32>,
      %c0_39 = arith.constant 0 : index
      %c0_40 = arith.constant 0 : index
      %62 = vector.load %arg10[%c0_39, %c0_40] : memref<8x1xf32, #tpu.memory_space<vmem>>, vector<8x1xf32>
      %63 = arith.mulf %48, %48 : vector<8x128xf32>
      %cst_41 = arith.constant dense<0.000000e+00> : vector<8xf32>
      %64 = vector.multi_reduction <add>, %63, %cst_41 [1] : vector<8x128xf32> to vector<8xf32>
      %65 = vector.shape_cast %64 : vector<8xf32> to vector<8x1xf32>
      %66 = arith.addf %62, %65 : vector<8x1xf32>
      %c0_42 = arith.constant 0 : index
      %c0_43 = arith.constant 0 : index
      %67 = vector.load %arg10[%c0_42, %c0_43] : memref<8x1xf32, #tpu.memory_space<vmem>>, vector<8x1xf32>
      tpu.vector_store %arg10[%c0_42, %c0_43], %66 {strides = array<i32>} : memref<8x1xf32, #tpu.memory_space<vmem>>, vector<8x1xf32>,
      %c0_44 = arith.constant 0 : index
      %c0_45 = arith.constant 0 : index
      %68 = vector.load %arg11[%c0_44, %c0_45] : memref<8x1xf32, #tpu.memory_space<vmem>>, vector<8x1xf32>
      %c2_i32_46 = arith.constant 2 : i32
      %69 = arith.muli %arg1, %c2_i32_46 : i32
      %c1_i32_47 = arith.constant 1 : i32
      %70 = arith.addi %69, %c1_i32_47 : i32
      %c1_i32_48 = arith.constant 1 : i32
      %71 = arith.muli %70, %c1_i32_48 : i32
      %72 = arith.addi %71, %arg2 : i32
      %73 = arith.index_cast %72 : i32 to index
      %c0_49 = arith.constant 0 : index
      %c0_50 = arith.constant 0 : index
      %74 = vector.load %arg8[%73, %c0_49, %c0_50] : memref<2x8x128xf32, #tpu.memory_space<vmem>>, vector<1x8x128xf32>
      %75 = vector.shape_cast %74 : vector<1x8x128xf32> to vector<8x128xf32>
      %76 = vector.broadcast %68 : vector<8x1xf32> to vector<8x128xf32>
      %77 = arith.mulf %76, %75 : vector<8x128xf32>
      %c0_51 = arith.constant 0 : index
      %c0_52 = arith.constant 0 : index
      %78 = vector.load %arg12[%c0_51, %c0_52] : memref<8x1xf32, #tpu.memory_space<vmem>>, vector<8x1xf32>
      %79 = vector.broadcast %78 : vector<8x1xf32> to vector<8x128xf32>
      %80 = arith.addf %77, %79 : vector<8x128xf32>
      %c1 = arith.constant 1 : index
      %c0_53 = arith.constant 0 : index
      %c0_54 = arith.constant 0 : index
      %81 = vector.load %arg7[%c1, %c0_53, %c0_54] : memref<2x8x128xf32, #tpu.memory_space<vmem>>, vector<1x8x128xf32>
      %82 = vector.shape_cast %81 : vector<1x8x128xf32> to vector<8x128xf32>
      %83 = vector.shape_cast %80 : vector<8x128xf32> to vector<1x8x128xf32>
      tpu.vector_store %arg7[%c1, %c0_53, %c0_54], %83 {strides = array<i32>} : memref<2x8x128xf32, #tpu.memory_space<vmem>>, vector<1x8x128xf32>,
      %c1_55 = arith.constant 1 : index
      %c0_56 = arith.constant 0 : index
      %c0_57 = arith.constant 0 : index
      %84 = vector.load %arg3[%c1_55, %c0_56, %c0_57] : memref<2x8x128xf32, #tpu.memory_space<vmem>>, vector<1x8x128xf32>
      %85 = vector.shape_cast %84 : vector<1x8x128xf32> to vector<8x128xf32>
      %86 = arith.addf %85, %80 : vector<8x128xf32>
      %c0_58 = arith.constant 0 : index
      %c0_59 = arith.constant 0 : index
      %c0_60 = arith.constant 0 : index
      %87 = vector.load %arg4[%c0_58, %c0_59, %c0_60] : memref<1x8x8xf32, #tpu.memory_space<vmem>>, vector<1x8x8xf32>
      %88 = vector.shape_cast %87 : vector<1x8x8xf32> to vector<8x8xf32>
      %cst_61 = arith.constant dense<0.000000e+00> : vector<8x128xf32>
      %89 = tpu.matmul %88, %86, %cst_61 {dimension_numbers = #tpu.dot_dimension_numbers<[1], [0], [0], [1], [0, 0, 1, 1], [], []>} : vector<8x8xf32>, vector<8x128xf32>, vector<8x128xf32> -> vector<8x128xf32>
      %cst_62 = arith.constant 0.000000e+00 : f32
      %90 = vector.broadcast %cst_62 : f32 to vector<8x128xf32>
      %91 = arith.maximumf %89, %90 : vector<8x128xf32>
      %c2_i32_63 = arith.constant 2 : i32
      %92 = arith.muli %arg1, %c2_i32_63 : i32
      %c1_i32_64 = arith.constant 1 : i32
      %93 = arith.addi %92, %c1_i32_64 : i32
      %c1_i32_65 = arith.constant 1 : i32
      %94 = arith.muli %93, %c1_i32_65 : i32
      %95 = arith.addi %94, %arg2 : i32
      %96 = arith.index_cast %95 : i32 to index
      %c0_66 = arith.constant 0 : index
      %c0_67 = arith.constant 0 : index
      %97 = vector.load %arg8[%96, %c0_66, %c0_67] : memref<2x8x128xf32, #tpu.memory_space<vmem>>, vector<1x8x128xf32>
      %98 = vector.shape_cast %97 : vector<1x8x128xf32> to vector<8x128xf32>
      %99 = vector.shape_cast %91 : vector<8x128xf32> to vector<1x8x128xf32>
      tpu.vector_store %arg8[%96, %c0_66, %c0_67], %99 {strides = array<i32>} : memref<2x8x128xf32, #tpu.memory_space<vmem>>, vector<1x8x128xf32>,
      %c0_68 = arith.constant 0 : index
      %c0_69 = arith.constant 0 : index
      %100 = vector.load %arg9[%c0_68, %c0_69] : memref<8x1xf32, #tpu.memory_space<vmem>>, vector<8x1xf32>
      %cst_70 = arith.constant dense<0.000000e+00> : vector<8xf32>
      %101 = vector.multi_reduction <add>, %91, %cst_70 [1] : vector<8x128xf32> to vector<8xf32>
      %102 = vector.shape_cast %101 : vector<8xf32> to vector<8x1xf32>
      %103 = arith.addf %100, %102 : vector<8x1xf32>
      %c0_71 = arith.constant 0 : index
      %c0_72 = arith.constant 0 : index
      %104 = vector.load %arg9[%c0_71, %c0_72] : memref<8x1xf32, #tpu.memory_space<vmem>>, vector<8x1xf32>
      tpu.vector_store %arg9[%c0_71, %c0_72], %103 {strides = array<i32>} : memref<8x1xf32, #tpu.memory_space<vmem>>, vector<8x1xf32>,
      %c0_73 = arith.constant 0 : index
      %c0_74 = arith.constant 0 : index
      %105 = vector.load %arg10[%c0_73, %c0_74] : memref<8x1xf32, #tpu.memory_space<vmem>>, vector<8x1xf32>
      %106 = arith.mulf %91, %91 : vector<8x128xf32>
      %cst_75 = arith.constant dense<0.000000e+00> : vector<8xf32>
      %107 = vector.multi_reduction <add>, %106, %cst_75 [1] : vector<8x128xf32> to vector<8xf32>
      %108 = vector.shape_cast %107 : vector<8xf32> to vector<8x1xf32>
      %109 = arith.addf %105, %108 : vector<8x1xf32>
      %c0_76 = arith.constant 0 : index
      %c0_77 = arith.constant 0 : index
      %110 = vector.load %arg10[%c0_76, %c0_77] : memref<8x1xf32, #tpu.memory_space<vmem>>, vector<8x1xf32>
      tpu.vector_store %arg10[%c0_76, %c0_77], %109 {strides = array<i32>} : memref<8x1xf32, #tpu.memory_space<vmem>>, vector<8x1xf32>,
    } else {
    }
    %c3_i32_9 = arith.constant 3 : i32
    %18 = arith.cmpi eq, %arg0, %c3_i32_9 : i32
    %19 = arith.extui %18 : i1 to i32
    %c0_i32_10 = arith.constant 0 : i32
    %20 = arith.cmpi ne, %19, %c0_i32_10 : i32
    scf.if %20 {
      %c0 = arith.constant 0 : index
      %c0_13 = arith.constant 0 : index
      %25 = vector.load %arg11[%c0, %c0_13] : memref<8x1xf32, #tpu.memory_space<vmem>>, vector<8x1xf32>
      %c2_i32 = arith.constant 2 : i32
      %26 = arith.muli %arg1, %c2_i32 : i32
      %c0_i32_14 = arith.constant 0 : i32
      %27 = arith.addi %26, %c0_i32_14 : i32
      %c1_i32 = arith.constant 1 : i32
      %28 = arith.muli %27, %c1_i32 : i32
      %29 = arith.addi %28, %arg2 : i32
      %30 = arith.index_cast %29 : i32 to index
      %c0_15 = arith.constant 0 : index
      %c0_16 = arith.constant 0 : index
      %31 = vector.load %arg8[%30, %c0_15, %c0_16] : memref<2x8x128xf32, #tpu.memory_space<vmem>>, vector<1x8x128xf32>
      %32 = vector.shape_cast %31 : vector<1x8x128xf32> to vector<8x128xf32>
      %33 = vector.broadcast %25 : vector<8x1xf32> to vector<8x128xf32>
      %34 = arith.mulf %33, %32 : vector<8x128xf32>
      %c0_17 = arith.constant 0 : index
      %c0_18 = arith.constant 0 : index
      %35 = vector.load %arg12[%c0_17, %c0_18] : memref<8x1xf32, #tpu.memory_space<vmem>>, vector<8x1xf32>
      %36 = vector.broadcast %35 : vector<8x1xf32> to vector<8x128xf32>
      %37 = arith.addf %34, %36 : vector<8x128xf32>
      %c0_19 = arith.constant 0 : index
      %c0_20 = arith.constant 0 : index
      %c0_21 = arith.constant 0 : index
      %38 = vector.load %arg7[%c0_19, %c0_20, %c0_21] : memref<2x8x128xf32, #tpu.memory_space<vmem>>, vector<1x8x128xf32>
      %39 = vector.shape_cast %38 : vector<1x8x128xf32> to vector<8x128xf32>
      %40 = vector.shape_cast %37 : vector<8x128xf32> to vector<1x8x128xf32>
      tpu.vector_store %arg7[%c0_19, %c0_20, %c0_21], %40 {strides = array<i32>} : memref<2x8x128xf32, #tpu.memory_space<vmem>>, vector<1x8x128xf32>,
      %c0_22 = arith.constant 0 : index
      %c0_23 = arith.constant 0 : index
      %41 = vector.load %arg11[%c0_22, %c0_23] : memref<8x1xf32, #tpu.memory_space<vmem>>, vector<8x1xf32>
      %c2_i32_24 = arith.constant 2 : i32
      %42 = arith.muli %arg1, %c2_i32_24 : i32
      %c1_i32_25 = arith.constant 1 : i32
      %43 = arith.addi %42, %c1_i32_25 : i32
      %c1_i32_26 = arith.constant 1 : i32
      %44 = arith.muli %43, %c1_i32_26 : i32
      %45 = arith.addi %44, %arg2 : i32
      %46 = arith.index_cast %45 : i32 to index
      %c0_27 = arith.constant 0 : index
      %c0_28 = arith.constant 0 : index
      %47 = vector.load %arg8[%46, %c0_27, %c0_28] : memref<2x8x128xf32, #tpu.memory_space<vmem>>, vector<1x8x128xf32>
      %48 = vector.shape_cast %47 : vector<1x8x128xf32> to vector<8x128xf32>
      %49 = vector.broadcast %41 : vector<8x1xf32> to vector<8x128xf32>
      %50 = arith.mulf %49, %48 : vector<8x128xf32>
      %c0_29 = arith.constant 0 : index
      %c0_30 = arith.constant 0 : index
      %51 = vector.load %arg12[%c0_29, %c0_30] : memref<8x1xf32, #tpu.memory_space<vmem>>, vector<8x1xf32>
      %52 = vector.broadcast %51 : vector<8x1xf32> to vector<8x128xf32>
      %53 = arith.addf %50, %52 : vector<8x128xf32>
      %c1 = arith.constant 1 : index
      %c0_31 = arith.constant 0 : index
      %c0_32 = arith.constant 0 : index
      %54 = vector.load %arg7[%c1, %c0_31, %c0_32] : memref<2x8x128xf32, #tpu.memory_space<vmem>>, vector<1x8x128xf32>
      %55 = vector.shape_cast %54 : vector<1x8x128xf32> to vector<8x128xf32>
      %56 = vector.shape_cast %53 : vector<8x128xf32> to vector<1x8x128xf32>
      tpu.vector_store %arg7[%c1, %c0_31, %c0_32], %56 {strides = array<i32>} : memref<2x8x128xf32, #tpu.memory_space<vmem>>, vector<1x8x128xf32>,
    } else {
    }
    %c3_i32_11 = arith.constant 3 : i32
    %21 = arith.cmpi slt, %arg0, %c3_i32_11 : i32
    %22 = arith.andi %21, %5 : i1
    %23 = arith.extui %22 : i1 to i32
    %c0_i32_12 = arith.constant 0 : i32
    %24 = arith.cmpi ne, %23, %c0_i32_12 : i32
    scf.if %24 {
      %c0 = arith.constant 0 : index
      %c0_13 = arith.constant 0 : index
      %25 = vector.load %arg9[%c0, %c0_13] : memref<8x1xf32, #tpu.memory_space<vmem>>, vector<8x1xf32>
      %cst = arith.constant 3.906250e-03 : f32
      %26 = vector.broadcast %cst : f32 to vector<8x1xf32>
      %27 = arith.mulf %25, %26 : vector<8x1xf32>
      %c0_14 = arith.constant 0 : index
      %c0_15 = arith.constant 0 : index
      %28 = vector.load %arg10[%c0_14, %c0_15] : memref<8x1xf32, #tpu.memory_space<vmem>>, vector<8x1xf32>
      %cst_16 = arith.constant 3.906250e-03 : f32
      %29 = vector.broadcast %cst_16 : f32 to vector<8x1xf32>
      %30 = arith.mulf %28, %29 : vector<8x1xf32>
      %31 = arith.mulf %27, %27 : vector<8x1xf32>
      %32 = arith.subf %30, %31 : vector<8x1xf32>
      %c0_17 = arith.constant 0 : index
      %c0_18 = arith.constant 0 : index
      %c0_19 = arith.constant 0 : index
      %33 = vector.load %arg5[%c0_17, %c0_18, %c0_19] : memref<1x8x1xf32, #tpu.memory_space<vmem>>, vector<1x8x1xf32>
      %34 = vector.shape_cast %33 : vector<1x8x1xf32> to vector<8x1xf32>
      %cst_20 = arith.constant 9.99999974E-6 : f32
      %35 = vector.broadcast %cst_20 : f32 to vector<8x1xf32>
      %36 = arith.addf %32, %35 : vector<8x1xf32>
      %37 = math.rsqrt %36 : vector<8x1xf32>
      %38 = arith.mulf %34, %37 : vector<8x1xf32>
      %c0_21 = arith.constant 0 : index
      %c0_22 = arith.constant 0 : index
      %39 = vector.load %arg11[%c0_21, %c0_22] : memref<8x1xf32, #tpu.memory_space<vmem>>, vector<8x1xf32>
      tpu.vector_store %arg11[%c0_21, %c0_22], %38 {strides = array<i32>} : memref<8x1xf32, #tpu.memory_space<vmem>>, vector<8x1xf32>,
      %c0_23 = arith.constant 0 : index
      %c0_24 = arith.constant 0 : index
      %c0_25 = arith.constant 0 : index
      %40 = vector.load %arg6[%c0_23, %c0_24, %c0_25] : memref<1x8x1xf32, #tpu.memory_space<vmem>>, vector<1x8x1xf32>
      %41 = vector.shape_cast %40 : vector<1x8x1xf32> to vector<8x1xf32>
      %42 = arith.mulf %27, %38 : vector<8x1xf32>
      %43 = arith.subf %41, %42 : vector<8x1xf32>
      %c0_26 = arith.constant 0 : index
      %c0_27 = arith.constant 0 : index
      %44 = vector.load %arg12[%c0_26, %c0_27] : memref<8x1xf32, #tpu.memory_space<vmem>>, vector<8x1xf32>
      tpu.vector_store %arg12[%c0_26, %c0_27], %43 {strides = array<i32>} : memref<8x1xf32, #tpu.memory_space<vmem>>, vector<8x1xf32>,
    } else {
    }
    return
  }
  func.func @transform_0(%arg0: i32, %arg1: i32, %arg2: i32) -> (i32, i32, i32) {
    %c3_i32 = arith.constant 3 : i32
    %0 = arith.cmpi slt, %arg0, %c3_i32 : i32
    %c0_i32 = arith.constant 0 : i32
    %1 = arith.select %0, %arg1, %c0_i32 : i32
    %c2_i32 = arith.constant 2 : i32
    %2 = arith.select %0, %arg0, %c2_i32 : i32
    %c0_i32_0 = arith.constant 0 : i32
    %3 = arith.select %0, %arg2, %c0_i32_0 : i32
    %c0_i32_1 = arith.constant 0 : i32
    return %1, %2, %3 : i32, i32, i32
  }
  func.func @transform_1(%arg0: i32, %arg1: i32, %arg2: i32) -> (i32, i32, i32) {
    %c2_i32 = arith.constant 2 : i32
    %0 = arith.minsi %arg0, %c2_i32 : i32
    %c0_i32 = arith.constant 0 : i32
    %c0_i32_0 = arith.constant 0 : i32
    %c0_i32_1 = arith.constant 0 : i32
    return %0, %c0_i32, %c0_i32_0 : i32, i32, i32
  }
  func.func @transform_2(%arg0: i32, %arg1: i32, %arg2: i32) -> (i32, i32, i32) {
    %c2_i32 = arith.constant 2 : i32
    %0 = arith.minsi %arg0, %c2_i32 : i32
    %c0_i32 = arith.constant 0 : i32
    %c0_i32_0 = arith.constant 0 : i32
    %c0_i32_1 = arith.constant 0 : i32
    return %0, %c0_i32, %c0_i32_0 : i32, i32, i32
  }
  func.func @transform_3(%arg0: i32, %arg1: i32, %arg2: i32) -> (i32, i32, i32) {
    %c2_i32 = arith.constant 2 : i32
    %0 = arith.minsi %arg0, %c2_i32 : i32
    %c0_i32 = arith.constant 0 : i32
    %c0_i32_0 = arith.constant 0 : i32
    %c0_i32_1 = arith.constant 0 : i32
    return %0, %c0_i32, %c0_i32_0 : i32, i32, i32
  }
  func.func @transform_4(%arg0: i32, %arg1: i32, %arg2: i32) -> (i32, i32, i32) {
    %c0_i32 = arith.constant 0 : i32
    %0 = arith.cmpi sgt, %arg0, %c0_i32 : i32
    %c0_i32_0 = arith.constant 0 : i32
    %1 = arith.select %0, %arg1, %c0_i32_0 : i32
    %c1_i32 = arith.constant 1 : i32
    %2 = arith.subi %arg0, %c1_i32 : i32
    %c0_i32_1 = arith.constant 0 : i32
    %3 = arith.select %0, %2, %c0_i32_1 : i32
    %c0_i32_2 = arith.constant 0 : i32
    %4 = arith.select %0, %arg2, %c0_i32_2 : i32
    %c0_i32_3 = arith.constant 0 : i32
    return %1, %3, %4 : i32, i32, i32
  }
}

</mosaic_0001>

<bundles_post_ra>
// kernel: res2conv1d_relu_bn.1
= control target key start
LH: loop header
LB: loop body
LE: loop exit
PB: predicated region body
PF: predicated region fallthrough
CT: control target
= control target key end

     0   :  { %s1666_s0 = inlined_call_operand.hbm [shape: f32[2,32,128], index: 0, kind: input, shape index: {}, may-alias: {0,4}]   ;;  %s1667_s1 = inlined_call_operand.vmem [shape: f32[3,8,8], index: 1, kind: input, shape index: {}]   ;;  %s1668_s2 = inlined_call_operand.vmem [shape: f32[3,8,1], index: 2, kind: input, shape index: {}]   ;;  %s1669_s3 = inlined_call_operand.vmem [shape: f32[3,8,1], index: 3, kind: input, shape index: {}]   ;;  %s1670_s4 = inlined_call_operand.hbm [shape: f32[2,32,128], index: 4, kind: output, shape index: {}, may-alias: {0,4}]  }
   0x1   :  { %1673 = sst [smem:[#allocation13_spill]] %s1666_s0 }
   0x2   :  { %9 = vsyncpa [#allocation8], 0 }
   0x3   :  { %11 = vsyncpa [#allocation8 + $0x1], 0 }
   0x4   :  { %12 = vsyncpa [#allocation9], 0 }
   0x5   :  { %14 = vsyncpa [#allocation9 + $0x1], 0  ;;  %s1395_s15 = smov 0   ;;  %s1397_s16 = smov 0  }
   0x6   :  { %s1399_s17 = smov 0   ;;  %s1401_s18 = smov 0  }
   0x7   :  { %s1403_s19 = smov 0   ;;  %s1405_s20 = smov 0  }
   0x8   :  { %s1407_s21 = smov 0   ;;  %s1409_s22 = smov 0  }
   0x9   :  { %s1411_s23 = smov 0  }
   0xa LB: > { %s1040_s24 = sadd.s32 4294967295, %s1353_s23   ;;  %s1041_s25 = sadd.s32 4294967294, %s1353_s23   ;;  %s1353_s23 = sphi %s1411_s23, %s20_s23   ;;  %s1349_s22 = sphi %s1409_s22, %s1691_s22   ;;  %s1345_s21 = sphi %s1407_s21, %s1690_s21   ;;  %s1341_s20 = sphi %s1405_s20, %s1689_s20   ;;  %s1337_s19 = sphi %s1403_s19, %s1688_s19   ;;  %s1333_s18 = sphi %s1401_s18, %s1687_s18   ;;  %s1329_s17 = sphi %s1399_s17, %s1686_s17   ;;  %s1325_s16 = sphi %s1397_s16, %s1685_s16   ;;  %s1321_s15 = sphi %s1395_s15, %s1684_s15  }
   0xb   : > { %s39_s26 = sadd.s32 1, %s1349_s22  ;;  %p43_p0 = scmp.lt.s32.totalorder %s1349_s22, 3 }
   0xc   : > { %p41_p1 = scmp.ge.s32.totalorder %s39_s26, 4  ;;  %s58_s27 = sadd.s32 1, %s1341_s20 }
   0xd   : > { %s1444_s28 = scalar_select %p43_p0, %s1349_s22, 2 }
   0xe   : > { %s1693_s26 = smov (%p41_p1, %s39_s26), 0  ;;  %p65_p2 = scmp.ne.s32.totalorder %s1341_s20, %s1337_s19 }
   0xf   : > { %p66_p3 = scmp.eq.s32.totalorder %s1353_s23, 0  ;;  %p47_p4 = scmp.lt.s32.totalorder %s1693_s26, 3 }
  0x10   : > { %p71_p5 = scmp.ne.s32.totalorder %s1337_s19, %s1333_s18  ;;  %p72_p7 = scmp.eq.s32.totalorder %s1040_s24, 0 }
  0x11   : > { %p1453_p6 = por %p66_p3, %p65_p2  ;;  %p171_p9 = scmp.gt.s32.totalorder %s1349_s22, 0 }
  0x12   : > { %s49_s30 = scalar_select %p47_p4, %s1693_s26, 2 }
  0x13   : > { %p1458_p8 = por %p72_p7, %p71_p5  ;;  %s1042_s7 = sadd.s32 4294967295, %s1349_s22 }
  0x14   : > { %s52_s6 = ssub.s32 %s1444_s28, %s49_s30  ;;  %p176_p11 = scmp.gt.s32.totalorder %s1693_s26, 0 }
  0x15   : > { %p56_p10 = scmp.eq.s32.totalorder %s52_s6, 0  ;;  %s1695_s7 = smov (!%p171_p9, %s1042_s7), 0 }
  0x16   : > { %s1043_s9 = sadd.s32 4294967295, %s1693_s26  ;;  %s188_s10 = sadd.s32 1, %s1329_s17 }
  0x17   : > { %s1467_s8 = scalar_select %p56_p10, %s1341_s20, %s58_s27  }
  0x18   : > { %s1697_s9 = smov (!%p176_p11, %s1043_s9), 0  ;;  %p198_p12 = scmp.ne.s32.totalorder %s1329_s17, %s1325_s16 }
  0x19   : > { %p199_p13 = scmp.eq.s32.totalorder %s1040_s24, 3  ;;  %s182_s11 = ssub.s32 %s1695_s7, %s1697_s9 }
  0x1a   : > { %p204_p0 = scmp.ne.s32.totalorder %s1325_s16, %s1321_s15  ;;  %p186_p1 = scmp.eq.s32.totalorder %s182_s11, 0 }
  0x1b   : > { %p1475_p2 = por %p199_p13, %p198_p12  ;;  %p205_p3 = scmp.eq.s32.totalorder %s1041_s25, 3 }
  0x1c   : > { %s1482_s13 = scalar_select %p186_p1, %s1329_s17, %s188_s10  }
  0x1d   : > { %s1676_s12 = scalar_select %p1475_p2, 1, 0 }
  0x1e   : > { %p1484_p4 = por %p205_p3, %p204_p0  ;;  %p1124_p5 = scmp.lt.s32.totalorder %s1353_s23, 4 }
  0x1f   : > { %s225_s18 = sand.u32 1, %s1341_s20   ;;  %s1047_s27 = sshll.u32 %s1444_s28, 7 }
  0x20   : > { %s1677_s14 = scalar_select %p1484_p4, 1, 0 }
  0x21   : > { %s1046_s24 = sshll.u32 %s225_s18, 4  ;;  %s1678_s0 = sld [smem:[#allocation13_spill]] }
  0x22   : > { %s229_s25 = scalar_lea.vmem [#allocation7], %s1046_s24  ;;  %p1498_p7 = pnand %p1124_p5, %p1453_p6 }
  0x23   : > { %s243_s9 = sshll.u32 %s229_s25, 4  ;;  %s1505_s28 = scalar_lea.sflag [#allocation8], %s225_s18  ;;  %s1502_s9 = int_to_ptr.vmem [resolvable:$true] %s243_s9 }
  0x24   : > { %p1219_p11 = pneg %p1498_p7 }
  0x27   : > { %s1494_s7 = scalar_lea.hbm %s1678_s0, %s1047_s27  ;;  %s1222_s24 = scalar_lea.hbm %s1678_s0, 1024 }
  0x28   : > { %s1217_s11 = scalar_lea.hbm %s1494_s7, 256  ;;  %p1223_p6 = scmp.lt.u32.totalorder %s1494_s7, %s1678_s0 }
  0x29   : > { %p1218_p10 = scmp.ne.s32.totalorder %s1494_s7, %s1217_s11  ;;  %p1224_p0 = scmp.lt.u32.totalorder %s1222_s24, %s1217_s11 }
  0x2a   : > { %p1226_p3 = scmp.lt.u32.totalorder %s1217_s11, %s1494_s7 }
  0x2b   : > { %p1220_p12 = pnand %p1219_p11, %p1218_p10  ;;  %p1225_p1 = por %p1224_p0, %p1223_p6 }
  0x2d   : > { %p1221_p13 = pneg %p1220_p12  ;;  %p1227_p5 = por %p1226_p3, %p1225_p1 }
  0x2f   : > { %p1228_p9 = pnand %p1227_p5, %p1221_p13 }
  0x31   : > { %1231 = shalt.err (!%p1228_p9)
}
  0x32   : > { %s1232_s18 = scalar_lea.vmem %s1502_s9, 256  ;;  %s1355_s25 = smov [#allocation7]  }
  0x33   : > { %p1233_p10 = scmp.ne.s32.totalorder %s1502_s9, %s1232_s18  ;;  %s1237_s29 = sshll.u32 %s1355_s25, 4  ;;  %s1238_s29 = int_to_ptr.vmem [resolvable:$false] %s1237_s29 }
  0x34   : > { %s1239_s27 = scalar_lea.vmem %s1238_s29, 512  ;;  %p1240_p2 = scmp.lt.s32.totalorder %s1502_s9, %s1238_s29 }
  0x35   : > { %p1235_p12 = pnand %p1233_p10, %p1219_p11  ;;  %p1241_p6 = scmp.lt.s32.totalorder %s1239_s27, %s1232_s18 }
  0x37   : > { %p1236_p4 = pneg %p1235_p12  ;;  %p1242_p0 = por %p1241_p6, %p1240_p2 }
  0x39   : > { %p1243_p1 = pnand %p1242_p0, %p1236_p4 }
  0x3b   : > { %1246 = shalt.err (!%p1243_p1)
}
  0x3c   : > { %s1356_s11 = smov 512   ;;  %s1357_s24 = smov 128  }
  0x3d   : > { %s1358_s30 = smov 8   ;;  %p284_p9 = scmp.lt.s32.totalorder %s1353_s23, 5 }
  0x3e   : > { %1119 = dma.hbm_to_vmem [thread:$0]  (!%p1498_p7), %s1494_s7, 256, %s1502_s9, %s1505_s28, %s1356_s11, %s1357_s24, %s1358_s30  }
  0x3f   : > { %p1680_p11 = scmp.ge.s32.totalorder %s1353_s23, 1 }
  0x41   : > { %p285_p13 = pnand %p1680_p11, %p284_p9 }
  0x42   : > { %s290_s6 = sand.u32 (!%p285_p13), 1, %s1337_s19  }
  0x43   : > { %288 = sbr.rel (%p285_p13) target bundleno = 1171 (0x493), region = 36  ;;  %s1049_s18 = sshll.u32 (!%p285_p13), %s290_s6, 4 }
  0x44   : > { %s291_s25 = scalar_lea.sflag (!%p285_p13), [#allocation8], %s290_s6  ;;  %s1537_s29 = scalar_lea.vmem (!%p285_p13), [#allocation7], %s1049_s18 }
  0x4a   : > { %1312 = dma.done.wait (%p1458_p8), %s291_s25, 256  }
  0x4b   : > { %1314 = vsyncadd (%p1458_p8), %s291_s25, 4294967040  ;;  %s1672_s7 = sand.u32 1, %s1325_s16   ;;  %p342_p2 = scmp.lt.s32.totalorder %s1345_s21, 2 }
  0x4c   : > { %s1050_s9 = sshll.u32 %s1672_s7, 4  ;;  %p376_p4 = scmp.lt.s32.totalorder %s1345_s21, 3 }
  0x4d   : > { %s343_s10 = scalar_select %p342_p2, %s1345_s21, 2 }
  0x4e   : > { %s1565_s0 = scalar_lea.vmem [#allocation10], %s1050_s9  ;;  %380 = sbr.rel (!%p376_p4) target bundleno = 85 (0x55), region = 44  ;;  %vm381_vm0 = vcmask (%p376_p4), 7168   ;;  %v1359_v0 = vmov (%p376_p4), 0.0  }
  0x4f   : > { %s1699_s10 = smov (!%p342_p2, %s343_s10), 2  ;;  %382 = vst.msk [vmem:[#allocation3] sm:$0xff] (%p376_p4), %vm381_vm0, %v1359_v0  ;;  %383 = vst.msk [vmem:[#allocation4] sm:$0xff] (%p376_p4), %vm381_vm0, %v1359_v0 }
  0x50   : > { %s1549_s28 = sshll.u32 %s1699_s10, 3 }
  0x51   : > { %s1555_s5 = scalar_lea.vmem %s1667_s1, %s1549_s28  ;;  %s355_s6 = scalar_lea.vmem %s1668_s2, %s1549_s28 }
  0x52   : > { %s363_s7 = scalar_lea.vmem %s1669_s3, %s1549_s28 }
  0x55 PF: > { %p1064_p8 = scmp.ne.s32.totalorder %s1345_s21, 0 }
  0x56   : > { %v388_v1 = vld [vmem:[%s1537_s29] sm:$0xff] (!%p1064_p8)  ;;  %vm390_vm1 = vcmask (!%p1064_p8), 64512   ;;  %v1066_v3 = vld [vmem:[%s1537_s29 + $0x8] sm:$0xff] (!%p1064_p8)  ;;  %v1360_v4 = vmov (!%p1064_p8), 0.0   ;;  %vm1361_vm2 = vmmov (!%p1064_p8), 0   ;;  %vm474_vm3 = vcmask (!%p1064_p8), 7168  }
  0x57   : > { %387 = sbr.rel (%p1064_p8) target bundleno = 462 (0x1ce), region = 48  ;;  %v389_v2 = vld [vmem:[%s1555_s5] sm:$0xff] (!%p1064_p8)  ;;  %1092 = vmatprep.subr.mxu0 (!%p1064_p8), %v1360_v4  ;;  %1094 = vmatprep.mubr.msk.f32.mxu0 (!%p1064_p8), %vm1361_vm2, %v1360_v4  ;;  %v470_v13 = vld [vmem:[#allocation3] sm:$0xff] (!%p1064_p8)  ;;  %v476_v16 = vld [vmem:[#allocation4] sm:$0xff] (!%p1064_p8) }
  0x58   : > { %1093 = vmatpush3.msra.mxu0 (!%p1064_p8), %v388_v1  ;;  %1097 = vmatprep.subr.mxu1 (!%p1064_p8), %v1360_v4 }
  0x59   : > { %1095 = vmatmul.mubr.msk.f32.vlgmr.msra.gmra.mrb[0].mxu0 (!%p1064_p8), %vm390_vm1, %v389_v2  ;;  %1098 = vmatpush3.msra.mxu1 (!%p1064_p8), %v1066_v3 }
  0x5a   : > { %1099 = vmatprep.mubr.msk.f32.mxu1 (!%p1064_p8), %vm1361_vm2, %v1360_v4 }
  0x5b   : > { %1100 = vmatmul.mubr.msk.f32.vlgmr.msra.gmra.mrb[0].mxu1 (!%p1064_p8), %vm390_vm1, %v389_v2 }
 0x12c   : > { %v460_v5 = vpop.f32.mrb[0].mxu0 }
 0x12d   : > { %v464_v6 = vmax.f32 %v460_v5, 0.0  ;;  %v1096_v7 = vpop.f32.mrb[1].mxu0 }
 0x12e   : > { %v554_v8 = vpop.f32.mrb[0].mxu1 }
 0x12f   : > { %469 = vst [vmem:[#allocation2] sm:$0xff] %v464_v6  ;;  %471 = vadd.xlane.f32.xlu0 %v464_v6  ;;  %v558_v9 = vmax.f32 %v554_v8, 0.0  ;;  %v1101_v10 = vpop.f32.mrb[1].mxu1  ;;  %v477_v11 = vmul.f32 %v464_v6, %v464_v6 }
 0x131   : > { %1068 = vst [vmem:[#allocation2 + $0x8] sm:$0xff] %v558_v9  ;;  %565 = vadd.xlane.f32.xlu1 %v558_v9  ;;  %v570_v12 = vmul.f32 %v558_v9, %v558_v9 }
 0x133   : > { %478 = vadd.xlane.f32.xlu0 %v477_v11 }
 0x135   : > { %571 = vadd.xlane.f32.xlu1 %v570_v12 }
 0x1bc   : > { %v472_v14 = vpop.xlane.xlu0 %471 }
 0x1bd   : > { %v473_v15 = vadd.f32 %v472_v14, %v470_v13 }
 0x1be   : > { %v566_v19 = vpop.xlane.xlu1 %565 }
 0x1bf   : > { %475 = vst.msk [vmem:[#allocation3] sm:$0xff] %vm474_vm3, %v473_v15 }
 0x1c0   : > { %v479_v17 = vpop.xlane.xlu0 %478 }
 0x1c1   : > { %v480_v18 = vadd.f32 %v479_v17, %v476_v16 }
 0x1c2   : > { %v572_v22 = vpop.xlane.xlu1 %571 }
 0x1c3   : > { %481 = vst.msk [vmem:[#allocation4] sm:$0xff] %vm474_vm3, %v480_v18 }
 0x1c6   : > { %v564_v20 = vld [vmem:[#allocation3] sm:$0xff] }
 0x1c7   : > { %v567_v21 = vadd.f32 %v566_v19, %v564_v20 }
 0x1c9   : > { %568 = vst.msk [vmem:[#allocation3] sm:$0xff] %vm474_vm3, %v567_v21 }
 0x1ca   : > { %v569_v23 = vld [vmem:[#allocation4] sm:$0xff] }
 0x1cb   : > { %v573_v24 = vadd.f32 %v572_v22, %v569_v23 }
 0x1cd   : > { %574 = vst.msk [vmem:[#allocation4] sm:$0xff] %vm474_vm3, %v573_v24 }
 0x1ce PF: > { %p575_p7 = scmp.gt.s32.totalorder %s1345_s21, 0 }
 0x1d0   : > { %p576_p3 = pnand %p575_p7, %p376_p4 }
 0x1d1   : > { %v580_v25 = vld [vmem:[#allocation5] sm:$0xff] (!%p576_p3)  ;;  %v1362_v26 = vmov (!%p576_p3), 0   ;;  %v592_v27 = vld [vmem:[#allocation6] sm:$0xff] (!%p576_p3)  ;;  %v1363_v28 = vmov (!%p576_p3), 0.0   ;;  %vm1364_vm4 = vmmov (!%p576_p3), 0   ;;  %vm603_vm5 = vcmask (!%p576_p3), 64512  }
 0x1d2   : > { %579 = sbr.rel (%p576_p3) target bundleno = 975 (0x3cf), region = 52  ;;  %1211 = vset.pattern.permute.xlu0 (!%p576_p3), %v1362_v26  ;;  %1212 = vset.pattern.permute.xlu1 (!%p576_p3), %v1362_v26  ;;  %v1070_v29 = vld [vmem:[#allocation2 + $0x8] sm:$0xff] (!%p576_p3)  ;;  %v585_v30 = vld [vmem:[#allocation2] sm:$0xff] (!%p576_p3)  ;;  %v679_v52 = vld [vmem:[#allocation3] sm:$0xff] (!%p576_p3)  ;;  %vm683_vm6 = vcmask (!%p576_p3), 7168  }
 0x1d3   : > { %588 = vperm.xlu0 (!%p576_p3), %1211, %v580_v25   ;;  %699 = vperm.xlu1 (!%p576_p3), %1212, %v580_v25   ;;  %v600_v37 = vld [vmem:[%s1537_s29] sm:$0xff] (!%p576_p3)  ;;  %v1072_v38 = vld [vmem:[%s1537_s29 + $0x8] sm:$0xff] (!%p576_p3) }
 0x1d4   : > { %1102 = vmatprep.subr.mxu0 (!%p576_p3), %v1363_v28  ;;  %1107 = vmatprep.subr.mxu1 (!%p576_p3), %v1363_v28  ;;  %v602_v42 = vld [vmem:[%s1555_s5] sm:$0xff] (!%p576_p3)  ;;  %v685_v54 = vld [vmem:[#allocation4] sm:$0xff] (!%p576_p3) }
 0x1d5   : > { %1104 = vmatprep.mubr.msk.f32.mxu0 (!%p576_p3), %vm1364_vm4, %v1363_v28  ;;  %1109 = vmatprep.mubr.msk.f32.mxu1 (!%p576_p3), %vm1364_vm4, %v1363_v28 }
 0x1d7   : > { %595 = vperm.xlu0 (!%p576_p3), %1211, %v592_v27   ;;  %706 = vperm.xlu1 (!%p576_p3), %1212, %v592_v27  }
 0x252   : > { %v589_v31 = vpop.permute.xlu0 %588  ;;  %v700_v32 = vpop.permute.xlu1 %699 }
 0x253   : > { %v702_v33 = vmul.f32 %v1070_v29, %v700_v32  ;;  %v591_v34 = vmul.f32 %v589_v31, %v585_v30 }
 0x256   : > { %v596_v35 = vpop.permute.xlu0 %595  ;;  %v707_v36 = vpop.permute.xlu1 %706 }
 0x257   : > { %v598_v39 = vadd.f32 %v596_v35, %v591_v34  ;;  %v709_v40 = vadd.f32 %v707_v36, %v702_v33 }
 0x259   : > { %599 = vst [vmem:[%s1565_s0] sm:$0xff] %v598_v39  ;;  %1071 = vst [vmem:[%s1565_s0 + $0x8] sm:$0xff] %v709_v40  ;;  %v601_v41 = vadd.f32 %v600_v37, %v598_v39  ;;  %v714_v43 = vadd.f32 %v1072_v38, %v709_v40 }
 0x25b   : > { %1103 = vmatpush3.msra.mxu0 %v601_v41  ;;  %1108 = vmatpush3.msra.mxu1 %v714_v43 }
 0x25c   : > { %1105 = vmatmul.mubr.msk.f32.vlgmr.msra.gmra.mrb[0].mxu0 %vm603_vm5, %v602_v42  ;;  %1110 = vmatmul.mubr.msk.f32.vlgmr.msra.gmra.mrb[0].mxu1 %vm603_vm5, %v602_v42 }
 0x32f   : > { %v673_v44 = vpop.f32.mrb[0].mxu0  ;;  %v785_v45 = vpop.f32.mrb[0].mxu1 }
 0x330   : > { %v677_v46 = vmax.f32 %v673_v44, 0.0  ;;  %v1106_v47 = vpop.f32.mrb[1].mxu0  ;;  %v789_v48 = vmax.f32 %v785_v45, 0.0  ;;  %v1111_v49 = vpop.f32.mrb[1].mxu1 }
 0x332   : > { %678 = vst [vmem:[#allocation2] sm:$0xff] %v677_v46  ;;  %680 = vadd.xlane.f32.xlu0 %v677_v46  ;;  %v686_v50 = vmul.f32 %v677_v46, %v677_v46  ;;  %1074 = vst [vmem:[#allocation2 + $0x8] sm:$0xff] %v789_v48  ;;  %v797_v51 = vmul.f32 %v789_v48, %v789_v48 }
 0x334   : > { %687 = vadd.xlane.f32.xlu1 %v686_v50 }
 0x336   : > { %792 = vadd.xlane.f32.xlu0 %v789_v48 }
 0x33a   : > { %798 = vadd.xlane.f32.xlu0 %v797_v51 }
 0x3bf   : > { %v681_v53 = vpop.xlane.xlu0 %680 }
 0x3c0   : > { %v682_v55 = vadd.f32 %v681_v53, %v679_v52 }
 0x3c1   : > { %v688_v56 = vpop.xlane.xlu1 %687 }
 0x3c2   : > { %684 = vst.msk [vmem:[#allocation3] sm:$0xff] %vm683_vm6, %v682_v55  ;;  %v689_v57 = vadd.f32 %v688_v56, %v685_v54 }
 0x3c3   : > { %v793_v58 = vpop.xlane.xlu0 %792 }
 0x3c4   : > { %690 = vst.msk [vmem:[#allocation4] sm:$0xff] %vm683_vm6, %v689_v57 }
 0x3c7   : > { %v799_v61 = vpop.xlane.xlu0 %798 }
 0x3c9   : > { %v791_v59 = vld [vmem:[#allocation3] sm:$0xff] }
 0x3ca   : > { %v794_v60 = vadd.f32 %v793_v58, %v791_v59 }
 0x3cb   : > { %v796_v62 = vld [vmem:[#allocation4] sm:$0xff] }
 0x3cc   : > { %795 = vst.msk [vmem:[#allocation3] sm:$0xff] %vm683_vm6, %v794_v60  ;;  %v800_v63 = vadd.f32 %v799_v61, %v796_v62 }
 0x3ce   : > { %801 = vst.msk [vmem:[#allocation4] sm:$0xff] %vm683_vm6, %v800_v63 }
 0x3cf PF: > { %p1075_p5 = scmp.ne.s32.totalorder %s1345_s21, 3 }
 0x3d0   : > { %v818_v0 = vld [vmem:[#allocation6] sm:$0xff] (!%p1075_p5)  ;;  %v806_v1 = vld [vmem:[#allocation5] sm:$0xff] (!%p1075_p5)  ;;  %v1365_v2 = vmov (!%p1075_p5), 0  }
 0x3d1   : > { %805 = sbr.rel (%p1075_p5) target bundleno = 1115 (0x45b), region = 56  ;;  %1214 = vset.pattern.permute.xlu1 (!%p1075_p5), %v1365_v2  ;;  %1213 = vset.pattern.permute.xlu0 (!%p1075_p5), %v1365_v2  ;;  %v811_v3 = vld [vmem:[#allocation2] sm:$0xff] (!%p1075_p5)  ;;  %v1076_v7 = vld [vmem:[#allocation2 + $0x8] sm:$0xff] (!%p1075_p5) }
 0x3d2   : > { %821 = vperm.xlu1 (!%p1075_p5), %1214, %v818_v0   ;;  %814 = vperm.xlu0 (!%p1075_p5), %1213, %v806_v1  }
 0x3d6   : > { %841 = vperm.xlu1 (!%p1075_p5), %1214, %v818_v0   ;;  %834 = vperm.xlu0 (!%p1075_p5), %1213, %v806_v1  }
 0x451   : > { %v822_v4 = vpop.permute.xlu1 %821  ;;  %v815_v5 = vpop.permute.xlu0 %814 }
 0x452   : > { %v817_v6 = vmul.f32 %v815_v5, %v811_v3 }
 0x454   : > { %v824_v8 = vadd.f32 %v822_v4, %v817_v6 }
 0x455   : > { %v835_v9 = vpop.permute.xlu0 %834  ;;  %v842_v11 = vpop.permute.xlu1 %841 }
 0x456   : > { %825 = vst [vmem:[%s1565_s0] sm:$0xff] %v824_v8  ;;  %v837_v10 = vmul.f32 %v1076_v7, %v835_v9 }
 0x458   : > { %v844_v12 = vadd.f32 %v842_v11, %v837_v10 }
 0x45a   : > { %1077 = vst [vmem:[%s1565_s0 + $0x8] sm:$0xff] %v844_v12 }
 0x45b PF: > { %848 = sbr.rel (!%p376_p4) target bundleno = 1142 (0x476), region = 60  ;;  %v849_v13 = vld [vmem:[#allocation3] sm:$0xff] (%p376_p4)  ;;  %v851_v14 = vld [vmem:[#allocation4] sm:$0xff] (%p376_p4)  ;;  %v855_v20 = vld [vmem:[%s355_s6] sm:$0xff] (%p376_p4)  ;;  %vm859_vm7 = vcmask (%p376_p4), 7168  }
 0x45c   : > { %v850_v15 = vmul.f32 (%p376_p4), 0.00390625, %v849_v13  ;;  %v852_v16 = vmul.f32 (%p376_p4), 0.00390625, %v851_v14  ;;  %v861_v23 = vld [vmem:[%s363_s7] sm:$0xff] (%p376_p4) }
 0x45e   : > { %v853_v17 = vmul.f32 (%p376_p4), %v850_v15, %v850_v15 }
 0x460   : > { %v854_v18 = vsub.f32 (%p376_p4), %v852_v16, %v853_v17 }
 0x462   : > { %v856_v19 = vadd.f32 1e-05, %v854_v18 }
 0x464   : > { %1215 = vrsqrt.f32 %v856_v19 }
 0x46e   : > { %v1216_v21 = vpop.eup %1215 }
 0x46f   : > { %v858_v22 = vmul.f32 %v1216_v21, %v855_v20 }
 0x471   : > { %860 = vst.msk [vmem:[#allocation5] sm:$0xff] %vm859_vm7, %v858_v22  ;;  %v862_v24 = vmul.f32 %v858_v22, %v850_v15 }
 0x473   : > { %v863_v25 = vsub.f32 %v861_v23, %v862_v24 }
 0x475   : > { %864 = vst.msk [vmem:[#allocation6] sm:$0xff] %vm859_vm7, %v863_v25 }
 0x476 PF: > { %s1079_s11 = sadd.s32 4294967295, %s1345_s21  ;;  %s887_s5 = sshll.u32 %s1565_s0, 4  ;;  %s1602_s5 = int_to_ptr.vmem [resolvable:$true] %s887_s5 }
 0x477   : > { %s1701_s11 = smov (!%p575_p7, %s1079_s11), 0  ;;  %s1681_s6 = sand.u32 1, %s1325_s16  }
 0x478   : > { %s1080_s24 = sshll.u32 %s1701_s11, 7  ;;  %s1611_s18 = scalar_lea.sflag [#allocation9], %s1681_s6 }
 0x479   : > { %s1607_s7 = scalar_lea.hbm %s1670_s4, %s1080_s24  ;;  %s1247_s25 = scalar_lea.vmem %s1602_s5, 256 }
 0x47a   : > { %p1248_p10 = scmp.ne.s32.totalorder %s1602_s5, %s1247_s25  ;;  %p1682_p12 = scmp.ne.s32.totalorder %s1676_s12, 0 }
 0x47b   : > { %s1366_s0 = smov [#allocation10]  }
 0x47c   : > { %p1249_p6 = pnand %p1248_p10, %p1682_p12  ;;  %s1251_s21 = sshll.u32 %s1366_s0, 4  ;;  %s1252_s21 = int_to_ptr.vmem [resolvable:$false] %s1251_s21 }
 0x47d   : > { %s1253_s29 = scalar_lea.vmem %s1252_s21, 512  ;;  %p1254_p1 = scmp.lt.s32.totalorder %s1602_s5, %s1252_s21 }
 0x47e   : > { %p1250_p0 = pneg %p1249_p6  ;;  %p1255_p9 = scmp.lt.s32.totalorder %s1253_s29, %s1247_s25 }
 0x480   : > { %p1256_p11 = por %p1255_p9, %p1254_p1 }
 0x482   : > { %p1257_p13 = pnand %p1256_p11, %p1250_p0 }
 0x484   : > { %1260 = shalt.err (!%p1257_p13)
}
 0x485   : > { %s1261_s9 = scalar_lea.hbm %s1607_s7, 256  ;;  %s1265_s11 = scalar_lea.hbm %s1670_s4, 1024 }
 0x486   : > { %p1262_p2 = scmp.ne.s32.totalorder %s1607_s7, %s1261_s9  ;;  %p1266_p7 = scmp.lt.u32.totalorder %s1607_s7, %s1670_s4 }
 0x487   : > { %p1267_p3 = scmp.lt.u32.totalorder %s1265_s11, %s1261_s9  ;;  %p1269_p10 = scmp.lt.u32.totalorder %s1261_s9, %s1607_s7 }
 0x488   : > { %p1263_p4 = pnand %p1262_p2, %p1682_p12 }
 0x489   : > { %p1268_p5 = por %p1267_p3, %p1266_p7 }
 0x48a   : > { %p1264_p8 = pneg %p1263_p4 }
 0x48b   : > { %p1270_p6 = por %p1269_p10, %p1268_p5 }
 0x48d   : > { %p1271_p0 = pnand %p1270_p6, %p1264_p8 }
 0x48f   : > { %1274 = shalt.err (!%p1271_p0)
}
 0x490   : > { %s1367_s28 = smov 128   ;;  %s1368_s6 = smov 512  }
 0x491   : > { %s1369_s25 = smov 8  }
 0x492   : > { %1114 = dma.vmem_to_hbm [thread:$0]  (%p1682_p12), %s1602_s5, 256, %s1607_s7, %s1611_s18, %s1367_s28, %s1368_s6, %s1369_s25  }
 0x493 PF: > { %p1125_p1 = scmp.ge.s32.totalorder %s1353_s23, 2  ;;  %s902_s0 = sand.u32 1, %s1321_s15  }
 0x494   : > { %p1683_p9 = scmp.ne.s32.totalorder %s1677_s14, 0  ;;  %s903_s21 = scalar_lea.sflag [#allocation9], %s902_s0 }
 0x496   : > { %p1121_p11 = pnand %p1125_p1, %p1683_p9 }
 0x498   : > { %1316 = dma.done.wait (!%p1121_p11), %s903_s21, 256  }
 0x499   : > { %1318 = vsyncadd (!%p1121_p11), %s903_s21, 4294967040  ;;  %s20_s23 = sadd.s32 1, %s1353_s23   ;;  %s1684_s15 = smov %s1325_s16 }
 0x49a   : > { %p17_p13 = scmp.ge.s32.totalorder %s20_s23, 6   ;;  %s1685_s16 = smov %s1329_s17 }
 0x49b   : > { %s1686_s17 = smov %s1482_s13  ;;  %s1687_s18 = smov %s1337_s19 }
 0x49c   : > { %s1688_s19 = smov %s1341_s20  ;;  %s1689_s20 = smov %s1467_s8 }
 0x49d   : > { %s1690_s21 = smov %s1349_s22  ;;  %s1691_s22 = smov %s1693_s26 }
 0x49e   :  { %19 = sbr.rel (!%p17_p13) target bundleno = 10 (0xa), region = 120 }
 0x4a5   :  { %908 = vsyncpa [#allocation8], 1 }
 0x4a6   :  { %910 = vsyncpa [#allocation8 + $0x1], 1 }
 0x4a7   :  { %911 = vsyncpa [#allocation9], 1 }
 0x4a8   :  { %913 = vsyncpa [#allocation9 + $0x1], 1 }

</bundles_post_ra>
